<compile_context>
chip_gen: v5e
topology: v5e:2x2
jax: 0.10.0
libtpu: 0.0.40
codegen_flags: <defaults>
</compile_context>

<pallas_src>
import functools

import jax
import jax.numpy as jnp
from jax.experimental import pallas as pl
from jax.experimental.pallas import tpu as pltpu

# ----------------------------- "params" object -----------------------------
Z_DIM = 8            # params.z_dim
CLASSES = 4          # params.classes
G_DIM = 32           # params.g_dim
X_DIM = 4            # params.x_dim
G_LAYERS = 2         # params.g_layers
G_NORM = True        # params.g_norm
G_NORM_TYPE = "layer"
ACT = "Mish"
LN_EPS = 1e-5        # nn.LayerNorm default eps

BATCH = 16

# Row layout of the packed small-vector table (single (NVEC, G_DIM) f32 input).
R_B1 = 0
R_MAPS_B = 1                      # rows [R_MAPS_B, R_MAPS_B + G_LAYERS)
R_GAMMA = R_MAPS_B + G_LAYERS     # LayerNorm weights
R_BETA = R_GAMMA + G_LAYERS       # LayerNorm biases
R_B3 = R_BETA + G_LAYERS          # padded to G_DIM columns (only [:X_DIM] used)
R_CMIN = R_B3 + 1
R_CMAX = R_CMIN + 1
NVEC = R_CMAX + 1                 # = 4 + 3*G_LAYERS


# ------------------------------ kernel helpers ------------------------------
def _mish(x):
    # Mish(x) = x * tanh(softplus(x)).
    # Single-EUP-transcendental form (one exp instead of exp + log1p + tanh):
    #   tanh(log(1+e)) = ((1+e)^2 - 1) / ((1+e)^2 + 1) = e*(e+2) / (e*(e+2) + 2)
    # The e*(e+2) form avoids catastrophic cancellation for very negative x.
    # Guard: e^2 overflows f32 for x >~ 44; for x > 20, Mish(x) == x to f32 precision.
    e = jnp.exp(jnp.minimum(x, 20.0))
    n = e * (e + 2.0)
    tanh_sp = n / (n + 2.0)
    # (n * pl.reciprocal(n + 2.0, approx=True) would shave the divide further, but the
    #  approximate vrcp costs ~1e-3-level accuracy and the kernel is overhead-bound here.)
    return jnp.where(x > 20.0, x, x * tanh_sp)


def _layernorm(x, gamma, beta):
    # nn.LayerNorm over the last dim, biased variance, eps=1e-5
    mu = jnp.mean(x, axis=-1, keepdims=True)
    var = jnp.mean(jnp.square(x - mu), axis=-1, keepdims=True)
    return (x - mu) * jax.lax.rsqrt(var + LN_EPS) * gamma + beta


# --------------------------------- kernel -----------------------------------
def generator_con_kernel(
    zc_ref,      # (TB, Z_DIM + CLASSES)        [z | one_hot(labels)]
    w1_ref,      # (Z_DIM + CLASSES, G_DIM)     embedding folded into W1
    maps_w_ref,  # (G_LAYERS, G_DIM, G_DIM)
    w3_ref,      # (G_DIM, X_DIM)
    vec_ref,     # (NVEC, G_DIM)                packed b1/maps_b/gamma/beta/b3/cmin/cmax
    o_ref,       # (TB, X_DIM)
):
    # h = Mish( [z|onehot] @ W1_folded + b1 )
    h = (jnp.dot(zc_ref[...], w1_ref[...], preferred_element_type=jnp.float32)
         + vec_ref[R_B1:R_B1 + 1, :])
    h = _mish(h)

    # g_norm == True branch: Mish(LayerNorm(maps[i](h)))
    for i in range(G_LAYERS):
        h = (jnp.dot(h, maps_w_ref[i], preferred_element_type=jnp.float32)
             + vec_ref[R_MAPS_B + i:R_MAPS_B + i + 1, :])
        h = _layernorm(h,
                       vec_ref[R_GAMMA + i:R_GAMMA + i + 1, :],
                       vec_ref[R_BETA + i:R_BETA + i + 1, :])
        h = _mish(h)

    # map3 + clamp to [cmin, cmax]
    y = (jnp.dot(h, w3_ref[...], preferred_element_type=jnp.float32)
         + vec_ref[R_B3:R_B3 + 1, 0:X_DIM])
    y = jnp.maximum(y, vec_ref[R_CMIN:R_CMIN + 1, 0:X_DIM])
    y = jnp.minimum(y, vec_ref[R_CMAX:R_CMAX + 1, 0:X_DIM])
    o_ref[...] = y.astype(o_ref.dtype)


# --------------------------------- wrapper -----------------------------------
@functools.partial(jax.jit, static_argnames=("tb",))
def generator_con_forward(z, labels, params, cmin, cmax, *, tb=None):
    B = z.shape[0]
    if tb is None:
        tb = B                      # whole batch in one grid step (16 rows = 2 sublane groups)
    assert B % tb == 0

    # glue (index -> one-hot); Embedding(labels) == one_hot(labels) @ emb_w
    onehot = jax.nn.one_hot(labels, CLASSES, dtype=jnp.float32)
    zc = jnp.concatenate([z, onehot], axis=-1)                 # (B, Z_DIM + CLASSES)

    # Fold embedding into W1 (exact): one_hot @ (E @ W1_emb) == (one_hot @ E) @ W1_emb.
    w1_folded = jnp.concatenate(
        [params["w1"][:Z_DIM],
         jnp.dot(params["emb_w"], params["w1"][Z_DIM:],
                 precision=jax.lax.Precision.HIGHEST)],
        axis=0)                                                # (Z_DIM + CLASSES, G_DIM)

    def pad_cols(v):  # (1, X_DIM) -> (1, G_DIM), zero padded (padding never read)
        return jnp.pad(v, ((0, 0), (0, G_DIM - v.shape[-1])))

    vecs = jnp.concatenate([
        params["b1"],                                          # row R_B1
        params["maps_b"].reshape(G_LAYERS, G_DIM),             # rows R_MAPS_B..
        params["gammas"].reshape(G_LAYERS, G_DIM),             # rows R_GAMMA..
        params["betas"].reshape(G_LAYERS, G_DIM),              # rows R_BETA..
        pad_cols(params["b3"]),                                # row R_B3
        pad_cols(cmin.astype(jnp.float32)),                    # row R_CMIN
        pad_cols(cmax.astype(jnp.float32)),                    # row R_CMAX
    ], axis=0)                                                 # (NVEC, G_DIM)

    in_specs = [
        pl.BlockSpec((tb, Z_DIM + CLASSES), lambda i: (i, 0)),          # zc
        pl.BlockSpec((Z_DIM + CLASSES, G_DIM), lambda i: (0, 0)),       # w1_folded
        pl.BlockSpec((G_LAYERS, G_DIM, G_DIM), lambda i: (0, 0, 0)),    # maps_w
        pl.BlockSpec((G_DIM, X_DIM), lambda i: (0, 0)),                 # w3
        pl.BlockSpec((NVEC, G_DIM), lambda i: (0, 0)),                  # packed vectors
    ]
    out_specs = pl.BlockSpec((tb, X_DIM), lambda i: (i, 0))

    return pl.pallas_call(
        generator_con_kernel,
        out_shape=jax.ShapeDtypeStruct((B, X_DIM), jnp.float32),
        grid=(B // tb,),
        in_specs=in_specs,
        out_specs=out_specs,
        compiler_params=pltpu.CompilerParams(
            dimension_semantics=("arbitrary",)),  # single step; no megacore micro-sharding
    )(zc, w1_folded, params["maps_w"], params["w3"], vecs)


# -------------------------- deterministic parameter init --------------------------
def init_params(key):
    ks = jax.random.split(key, 8)

    def kaiming(k, fan_in, shape):
        # nn.init.kaiming_normal_ (fan_in, gain=sqrt(2)), applied to every ndim>1 param
        return jax.random.normal(k, shape, jnp.float32) * jnp.sqrt(2.0 / fan_in)

    emb_w = kaiming(ks[0], CLASSES, (CLASSES, CLASSES))
    w1 = kaiming(ks[1], Z_DIM + CLASSES, (Z_DIM + CLASSES, G_DIM))
    b1 = 0.01 * jax.random.normal(ks[2], (1, G_DIM), jnp.float32)
    maps_w = kaiming(ks[3], G_DIM, (G_LAYERS, G_DIM, G_DIM))
    maps_b = 0.01 * jax.random.normal(ks[4], (G_LAYERS, 1, G_DIM), jnp.float32)
    gammas = jnp.ones((G_LAYERS, 1, G_DIM), jnp.float32)   # LayerNorm default init
    betas = jnp.zeros((G_LAYERS, 1, G_DIM), jnp.float32)
    w3 = kaiming(ks[5], G_DIM, (G_DIM, X_DIM))
    b3 = 0.01 * jax.random.normal(ks[6], (1, X_DIM), jnp.float32)
    return dict(emb_w=emb_w, w1=w1, b1=b1, maps_w=maps_w, maps_b=maps_b,
                gammas=gammas, betas=betas, w3=w3, b3=b3)


# ------------------------------ pure-JAX reference ------------------------------
def reference_forward(z, labels, p, cmin, cmax):
    def mish(x):
        return x * jnp.tanh(jax.nn.softplus(x))

    emb = p["emb_w"][labels]                                   # nn.Embedding
    h = jnp.concatenate([z, emb], axis=-1) @ p["w1"] + p["b1"]
    h = mish(h)
    for i in range(G_LAYERS):
        h = h @ p["maps_w"][i] + p["maps_b"][i]
        mu = jnp.mean(h, axis=-1, keepdims=True)
        var = jnp.mean(jnp.square(h - mu), axis=-1, keepdims=True)
        h = (h - mu) / jnp.sqrt(var + LN_EPS) * p["gammas"][i] + p["betas"][i]
        h = mish(h)
    y = h @ p["w3"] + p["b3"]
    y = jnp.maximum(y, cmin)
    y = jnp.minimum(y, cmax)
    return y


# ------------------------------------ main ------------------------------------
if __name__ == "__main__":
    key = jax.random.PRNGKey(0)
    k_z, k_lab, k_p = jax.random.split(key, 3)

    z = jax.random.normal(k_z, (BATCH, Z_DIM), jnp.float32)
    labels = jax.random.randint(k_lab, (BATCH,), 0, CLASSES, jnp.int32)
    params = init_params(k_p)

    # clamp bounds (cmin < cmax), shape [1, X_DIM] so they broadcast like torch.max(x, cmin)
    cmin = (-0.8 + 0.05 * jnp.arange(X_DIM, dtype=jnp.float32))[None, :]
    cmax = (0.8 + 0.05 * jnp.arange(X_DIM, dtype=jnp.float32))[None, :]

    out = generator_con_forward(z, labels, params, cmin, cmax)
    out = jax.block_until_ready(out)

    ref = reference_forward(z, labels, params, cmin, cmax)
    assert out.shape == (BATCH, X_DIM)
    # 1e-4: the single-exp Mish and trace-time embedding fold are mathematically exact but
    # differ from the reference formulation by a few ulps, amplified through 4 matmuls.
    assert jnp.allclose(out, ref, atol=1e-4, rtol=1e-4), "mismatch vs pure-JAX reference"

    print("KERNEL_OK")
</pallas_src>

<mosaic_0001>
module attributes {stable_mosaic.version = 11 : i64} {
  func.func @generator_con_kernel(%arg0: i32, %arg1: memref<16x12xf32, #tpu.memory_space<vmem>>, %arg2: memref<12x32xf32, #tpu.memory_space<vmem>>, %arg3: memref<2x32x32xf32, #tpu.memory_space<vmem>>, %arg4: memref<32x4xf32, #tpu.memory_space<vmem>>, %arg5: memref<10x32xf32, #tpu.memory_space<vmem>>, %arg6: memref<16x4xf32, #tpu.memory_space<vmem>>) attributes {dimension_semantics = [#tpu.dimension_semantics<arbitrary>], iteration_bounds = array<i64: 1>, scalar_prefetch = 0 : i64, scratch_operands = 0 : i64, tpu.core_type = #tpu.core_type<tc>, window_params = [{transform_indices = @transform_0, window_bounds = array<i64: 16, 12>}, {pipeline_mode = #tpu.pipeline_mode<synchronous>, transform_indices = @transform_1, window_bounds = array<i64: 12, 32>}, {pipeline_mode = #tpu.pipeline_mode<synchronous>, transform_indices = @transform_2, window_bounds = array<i64: 2, 32, 32>}, {pipeline_mode = #tpu.pipeline_mode<synchronous>, transform_indices = @transform_3, window_bounds = array<i64: 32, 4>}, {pipeline_mode = #tpu.pipeline_mode<synchronous>, transform_indices = @transform_4, window_bounds = array<i64: 10, 32>}, {transform_indices = @transform_5, window_bounds = array<i64: 16, 4>}]} {
    %c0 = arith.constant 0 : index
    %c0_0 = arith.constant 0 : index
    %0 = vector.load %arg1[%c0, %c0_0] : memref<16x12xf32, #tpu.memory_space<vmem>>, vector<16x12xf32>
    %c0_1 = arith.constant 0 : index
    %c0_2 = arith.constant 0 : index
    %1 = vector.load %arg2[%c0_1, %c0_2] : memref<12x32xf32, #tpu.memory_space<vmem>>, vector<12x32xf32>
    %cst = arith.constant dense<0.000000e+00> : vector<16x32xf32>
    %2 = tpu.matmul %0, %1, %cst {dimension_numbers = #tpu.dot_dimension_numbers<[1], [0], [0], [1], [0, 0, 1, 1], [], []>} : vector<16x12xf32>, vector<12x32xf32>, vector<16x32xf32> -> vector<16x32xf32>
    %c0_3 = arith.constant 0 : index
    %c0_4 = arith.constant 0 : index
    %3 = vector.load %arg5[%c0_3, %c0_4] : memref<10x32xf32, #tpu.memory_space<vmem>>, vector<1x32xf32>
    %4 = vector.broadcast %3 : vector<1x32xf32> to vector<16x32xf32>
    %5 = arith.addf %2, %4 : vector<16x32xf32>
    %cst_5 = arith.constant 2.000000e+01 : f32
    %6 = vector.broadcast %cst_5 : f32 to vector<16x32xf32>
    %7 = arith.minimumf %5, %6 : vector<16x32xf32>
    %8 = math.exp %7 : vector<16x32xf32>
    %cst_6 = arith.constant 2.000000e+00 : f32
    %9 = vector.broadcast %cst_6 : f32 to vector<16x32xf32>
    %10 = arith.addf %8, %9 : vector<16x32xf32>
    %11 = arith.mulf %8, %10 : vector<16x32xf32>
    %cst_7 = arith.constant 2.000000e+00 : f32
    %12 = vector.broadcast %cst_7 : f32 to vector<16x32xf32>
    %13 = arith.addf %11, %12 : vector<16x32xf32>
    %14 = arith.divf %11, %13 : vector<16x32xf32>
    %cst_8 = arith.constant 2.000000e+01 : f32
    %15 = vector.broadcast %cst_8 : f32 to vector<16x32xf32>
    %16 = arith.cmpf ogt, %5, %15 : vector<16x32xf32>
    %17 = arith.mulf %5, %14 : vector<16x32xf32>
    %18 = arith.select %16, %5, %17 : vector<16x32xi1>, vector<16x32xf32>
    %c0_9 = arith.constant 0 : index
    %c0_10 = arith.constant 0 : index
    %c0_11 = arith.constant 0 : index
    %19 = vector.load %arg3[%c0_9, %c0_10, %c0_11] : memref<2x32x32xf32, #tpu.memory_space<vmem>>, vector<1x32x32xf32>
    %20 = vector.shape_cast %19 : vector<1x32x32xf32> to vector<32x32xf32>
    %cst_12 = arith.constant dense<0.000000e+00> : vector<16x32xf32>
    %21 = tpu.matmul %18, %20, %cst_12 {dimension_numbers = #tpu.dot_dimension_numbers<[1], [0], [0], [1], [0, 0, 1, 1], [], []>} : vector<16x32xf32>, vector<32x32xf32>, vector<16x32xf32> -> vector<16x32xf32>
    %c1 = arith.constant 1 : index
    %c0_13 = arith.constant 0 : index
    %22 = vector.load %arg5[%c1, %c0_13] : memref<10x32xf32, #tpu.memory_space<vmem>>, vector<1x32xf32>
    %23 = vector.broadcast %22 : vector<1x32xf32> to vector<16x32xf32>
    %24 = arith.addf %21, %23 : vector<16x32xf32>
    %c3 = arith.constant 3 : index
    %c0_14 = arith.constant 0 : index
    %25 = vector.load %arg5[%c3, %c0_14] : memref<10x32xf32, #tpu.memory_space<vmem>>, vector<1x32xf32>
    %c5 = arith.constant 5 : index
    %c0_15 = arith.constant 0 : index
    %26 = vector.load %arg5[%c5, %c0_15] : memref<10x32xf32, #tpu.memory_space<vmem>>, vector<1x32xf32>
    %cst_16 = arith.constant dense<0.000000e+00> : vector<16xf32>
    %27 = vector.multi_reduction <add>, %24, %cst_16 [1] : vector<16x32xf32> to vector<16xf32>
    %28 = vector.shape_cast %27 : vector<16xf32> to vector<16x1xf32>
    %cst_17 = arith.constant 3.200000e+01 : f32
    %29 = vector.broadcast %cst_17 : f32 to vector<16x1xf32>
    %30 = arith.divf %28, %29 : vector<16x1xf32>
    %31 = vector.broadcast %30 : vector<16x1xf32> to vector<16x32xf32>
    %32 = arith.subf %24, %31 : vector<16x32xf32>
    %33 = arith.mulf %32, %32 : vector<16x32xf32>
    %cst_18 = arith.constant dense<0.000000e+00> : vector<16xf32>
    %34 = vector.multi_reduction <add>, %33, %cst_18 [1] : vector<16x32xf32> to vector<16xf32>
    %35 = vector.shape_cast %34 : vector<16xf32> to vector<16x1xf32>
    %cst_19 = arith.constant 3.200000e+01 : f32
    %36 = vector.broadcast %cst_19 : f32 to vector<16x1xf32>
    %37 = arith.divf %35, %36 : vector<16x1xf32>
    %38 = vector.broadcast %30 : vector<16x1xf32> to vector<16x32xf32>
    %39 = arith.subf %24, %38 : vector<16x32xf32>
    %cst_20 = arith.constant 9.99999974E-6 : f32
    %40 = vector.broadcast %cst_20 : f32 to vector<16x1xf32>
    %41 = arith.addf %37, %40 : vector<16x1xf32>
    %42 = math.rsqrt %41 : vector<16x1xf32>
    %43 = vector.broadcast %42 : vector<16x1xf32> to vector<16x32xf32>
    %44 = arith.mulf %39, %43 : vector<16x32xf32>
    %45 = vector.broadcast %25 : vector<1x32xf32> to vector<16x32xf32>
    %46 = arith.mulf %44, %45 : vector<16x32xf32>
    %47 = vector.broadcast %26 : vector<1x32xf32> to vector<16x32xf32>
    %48 = arith.addf %46, %47 : vector<16x32xf32>
    %cst_21 = arith.constant 2.000000e+01 : f32
    %49 = vector.broadcast %cst_21 : f32 to vector<16x32xf32>
    %50 = arith.minimumf %48, %49 : vector<16x32xf32>
    %51 = math.exp %50 : vector<16x32xf32>
    %cst_22 = arith.constant 2.000000e+00 : f32
    %52 = vector.broadcast %cst_22 : f32 to vector<16x32xf32>
    %53 = arith.addf %51, %52 : vector<16x32xf32>
    %54 = arith.mulf %51, %53 : vector<16x32xf32>
    %cst_23 = arith.constant 2.000000e+00 : f32
    %55 = vector.broadcast %cst_23 : f32 to vector<16x32xf32>
    %56 = arith.addf %54, %55 : vector<16x32xf32>
    %57 = arith.divf %54, %56 : vector<16x32xf32>
    %cst_24 = arith.constant 2.000000e+01 : f32
    %58 = vector.broadcast %cst_24 : f32 to vector<16x32xf32>
    %59 = arith.cmpf ogt, %48, %58 : vector<16x32xf32>
    %60 = arith.mulf %48, %57 : vector<16x32xf32>
    %61 = arith.select %59, %48, %60 : vector<16x32xi1>, vector<16x32xf32>
    %c1_25 = arith.constant 1 : index
    %c0_26 = arith.constant 0 : index
    %c0_27 = arith.constant 0 : index
    %62 = vector.load %arg3[%c1_25, %c0_26, %c0_27] : memref<2x32x32xf32, #tpu.memory_space<vmem>>, vector<1x32x32xf32>
    %63 = vector.shape_cast %62 : vector<1x32x32xf32> to vector<32x32xf32>
    %cst_28 = arith.constant dense<0.000000e+00> : vector<16x32xf32>
    %64 = tpu.matmul %61, %63, %cst_28 {dimension_numbers = #tpu.dot_dimension_numbers<[1], [0], [0], [1], [0, 0, 1, 1], [], []>} : vector<16x32xf32>, vector<32x32xf32>, vector<16x32xf32> -> vector<16x32xf32>
    %c2 = arith.constant 2 : index
    %c0_29 = arith.constant 0 : index
    %65 = vector.load %arg5[%c2, %c0_29] : memref<10x32xf32, #tpu.memory_space<vmem>>, vector<1x32xf32>
    %66 = vector.broadcast %65 : vector<1x32xf32> to vector<16x32xf32>
    %67 = arith.addf %64, %66 : vector<16x32xf32>
    %c4 = arith.constant 4 : index
    %c0_30 = arith.constant 0 : index
    %68 = vector.load %arg5[%c4, %c0_30] : memref<10x32xf32, #tpu.memory_space<vmem>>, vector<1x32xf32>
    %c6 = arith.constant 6 : index
    %c0_31 = arith.constant 0 : index
    %69 = vector.load %arg5[%c6, %c0_31] : memref<10x32xf32, #tpu.memory_space<vmem>>, vector<1x32xf32>
    %cst_32 = arith.constant dense<0.000000e+00> : vector<16xf32>
    %70 = vector.multi_reduction <add>, %67, %cst_32 [1] : vector<16x32xf32> to vector<16xf32>
    %71 = vector.shape_cast %70 : vector<16xf32> to vector<16x1xf32>
    %cst_33 = arith.constant 3.200000e+01 : f32
    %72 = vector.broadcast %cst_33 : f32 to vector<16x1xf32>
    %73 = arith.divf %71, %72 : vector<16x1xf32>
    %74 = vector.broadcast %73 : vector<16x1xf32> to vector<16x32xf32>
    %75 = arith.subf %67, %74 : vector<16x32xf32>
    %76 = arith.mulf %75, %75 : vector<16x32xf32>
    %cst_34 = arith.constant dense<0.000000e+00> : vector<16xf32>
    %77 = vector.multi_reduction <add>, %76, %cst_34 [1] : vector<16x32xf32> to vector<16xf32>
    %78 = vector.shape_cast %77 : vector<16xf32> to vector<16x1xf32>
    %cst_35 = arith.constant 3.200000e+01 : f32
    %79 = vector.broadcast %cst_35 : f32 to vector<16x1xf32>
    %80 = arith.divf %78, %79 : vector<16x1xf32>
    %81 = vector.broadcast %73 : vector<16x1xf32> to vector<16x32xf32>
    %82 = arith.subf %67, %81 : vector<16x32xf32>
    %cst_36 = arith.constant 9.99999974E-6 : f32
    %83 = vector.broadcast %cst_36 : f32 to vector<16x1xf32>
    %84 = arith.addf %80, %83 : vector<16x1xf32>
    %85 = math.rsqrt %84 : vector<16x1xf32>
    %86 = vector.broadcast %85 : vector<16x1xf32> to vector<16x32xf32>
    %87 = arith.mulf %82, %86 : vector<16x32xf32>
    %88 = vector.broadcast %68 : vector<1x32xf32> to vector<16x32xf32>
    %89 = arith.mulf %87, %88 : vector<16x32xf32>
    %90 = vector.broadcast %69 : vector<1x32xf32> to vector<16x32xf32>
    %91 = arith.addf %89, %90 : vector<16x32xf32>
    %cst_37 = arith.constant 2.000000e+01 : f32
    %92 = vector.broadcast %cst_37 : f32 to vector<16x32xf32>
    %93 = arith.minimumf %91, %92 : vector<16x32xf32>
    %94 = math.exp %93 : vector<16x32xf32>
    %cst_38 = arith.constant 2.000000e+00 : f32
    %95 = vector.broadcast %cst_38 : f32 to vector<16x32xf32>
    %96 = arith.addf %94, %95 : vector<16x32xf32>
    %97 = arith.mulf %94, %96 : vector<16x32xf32>
    %cst_39 = arith.constant 2.000000e+00 : f32
    %98 = vector.broadcast %cst_39 : f32 to vector<16x32xf32>
    %99 = arith.addf %97, %98 : vector<16x32xf32>
    %100 = arith.divf %97, %99 : vector<16x32xf32>
    %cst_40 = arith.constant 2.000000e+01 : f32
    %101 = vector.broadcast %cst_40 : f32 to vector<16x32xf32>
    %102 = arith.cmpf ogt, %91, %101 : vector<16x32xf32>
    %103 = arith.mulf %91, %100 : vector<16x32xf32>
    %104 = arith.select %102, %91, %103 : vector<16x32xi1>, vector<16x32xf32>
    %c0_41 = arith.constant 0 : index
    %c0_42 = arith.constant 0 : index
    %105 = vector.load %arg4[%c0_41, %c0_42] : memref<32x4xf32, #tpu.memory_space<vmem>>, vector<32x4xf32>
    %cst_43 = arith.constant dense<0.000000e+00> : vector<16x4xf32>
    %106 = tpu.matmul %104, %105, %cst_43 {dimension_numbers = #tpu.dot_dimension_numbers<[1], [0], [0], [1], [0, 0, 1, 1], [], []>} : vector<16x32xf32>, vector<32x4xf32>, vector<16x4xf32> -> vector<16x4xf32>
    %c7 = arith.constant 7 : index
    %c0_44 = arith.constant 0 : index
    %107 = vector.load %arg5[%c7, %c0_44] : memref<10x32xf32, #tpu.memory_space<vmem>>, vector<1x4xf32>
    %108 = vector.broadcast %107 : vector<1x4xf32> to vector<16x4xf32>
    %109 = arith.addf %106, %108 : vector<16x4xf32>
    %c8 = arith.constant 8 : index
    %c0_45 = arith.constant 0 : index
    %110 = vector.load %arg5[%c8, %c0_45] : memref<10x32xf32, #tpu.memory_space<vmem>>, vector<1x4xf32>
    %111 = vector.broadcast %110 : vector<1x4xf32> to vector<16x4xf32>
    %112 = arith.maximumf %109, %111 : vector<16x4xf32>
    %c9 = arith.constant 9 : index
    %c0_46 = arith.constant 0 : index
    %113 = vector.load %arg5[%c9, %c0_46] : memref<10x32xf32, #tpu.memory_space<vmem>>, vector<1x4xf32>
    %114 = vector.broadcast %113 : vector<1x4xf32> to vector<16x4xf32>
    %115 = arith.minimumf %112, %114 : vector<16x4xf32>
    %c0_47 = arith.constant 0 : index
    %c0_48 = arith.constant 0 : index
    %116 = vector.load %arg6[%c0_47, %c0_48] : memref<16x4xf32, #tpu.memory_space<vmem>>, vector<16x4xf32>
    tpu.vector_store %arg6[%c0_47, %c0_48], %115 {strides = array<i32>} : memref<16x4xf32, #tpu.memory_space<vmem>>, vector<16x4xf32>,
    return
  }
  func.func @transform_0(%arg0: i32) -> (i32, i32) {
    %c0_i32 = arith.constant 0 : i32
    %c0_i32_0 = arith.constant 0 : i32
    return %arg0, %c0_i32 : i32, i32
  }
  func.func @transform_1(%arg0: i32) -> (i32, i32) {
    %c0_i32 = arith.constant 0 : i32
    %c0_i32_0 = arith.constant 0 : i32
    %c0_i32_1 = arith.constant 0 : i32
    return %c0_i32, %c0_i32_0 : i32, i32
  }
  func.func @transform_2(%arg0: i32) -> (i32, i32, i32) {
    %c0_i32 = arith.constant 0 : i32
    %c0_i32_0 = arith.constant 0 : i32
    %c0_i32_1 = arith.constant 0 : i32
    %c0_i32_2 = arith.constant 0 : i32
    return %c0_i32, %c0_i32_0, %c0_i32_1 : i32, i32, i32
  }
  func.func @transform_3(%arg0: i32) -> (i32, i32) {
    %c0_i32 = arith.constant 0 : i32
    %c0_i32_0 = arith.constant 0 : i32
    %c0_i32_1 = arith.constant 0 : i32
    return %c0_i32, %c0_i32_0 : i32, i32
  }
  func.func @transform_4(%arg0: i32) -> (i32, i32) {
    %c0_i32 = arith.constant 0 : i32
    %c0_i32_0 = arith.constant 0 : i32
    %c0_i32_1 = arith.constant 0 : i32
    return %c0_i32, %c0_i32_0 : i32, i32
  }
  func.func @transform_5(%arg0: i32) -> (i32, i32) {
    %c0_i32 = arith.constant 0 : i32
    %c0_i32_0 = arith.constant 0 : i32
    return %arg0, %c0_i32 : i32, i32
  }
}

</mosaic_0001>

<bundles_post_ra>
// kernel: generator_con_forward.1
= control target key start
LH: loop header
LB: loop body
LE: loop exit
PB: predicated region body
PF: predicated region fallthrough
CT: control target
= control target key end

     0   :  { %vm33_vm0 = vcmask 1043456   ;;  %vm26_vm1 = vcmask 97280   ;;  %vm114_vm6 = vcmask 261120   ;;  %v495_v58 = vmov 32.0   ;;  %s634_s1 = inlined_call_operand.vmem [shape: f32[12,32], index: 1, kind: input, shape index: {}]   ;;  %s635_s0 = inlined_call_operand.vmem [shape: f32[16,12], index: 0, kind: input, shape index: {}]   ;;  %s636_s4 = inlined_call_operand.vmem [shape: f32[10,32], index: 4, kind: input, shape index: {}]   ;;  %s637_s2 = inlined_call_operand.vmem [shape: f32[2,32,32], index: 2, kind: input, shape index: {}]   ;;  %s638_s3 = inlined_call_operand.vmem [shape: f32[32,4], index: 3, kind: input, shape index: {}]   ;;  %s639_s5 = inlined_call_operand.vmem [shape: f32[16,4], index: 5, kind: output, shape index: {}]  }
   0x1   :  { %v23_v0 = vld [vmem:[%s634_s1 + $0x8] sm:$0xf]  ;;  %v22_v1 = vld [vmem:[%s634_s1] sm:$0xff]  ;;  %v111_v4 = vld [vmem:[%s637_s2 + $0x18] sm:$0xff] }
   0x2   :  { %437 = vmatpush.msk.msra.mxu0 %vm33_vm0, %v23_v0  ;;  %v20_v2 = vld [vmem:[%s635_s0] sm:$0xff]  ;;  %v21_v3 = vld [vmem:[%s635_s0 + $0x8] sm:$0xff]  ;;  %v110_v5 = vld [vmem:[%s637_s2 + $0x10] sm:$0xff]  ;;  %133 = vmatpush.msra.mxu1 %v111_v4 }
   0x3   :  { %v109_v6 = vld [vmem:[%s637_s2 + $0x8] sm:$0xff]  ;;  %v108_v7 = vld [vmem:[%s637_s2] sm:$0xff] }
   0x4   :  { %52 = vmatpush.msra.mxu0 %v22_v1  ;;  %134 = vmatpush.msra.mxu1 %v110_v5  ;;  %v451_v8 = vld [vmem:[%s636_s4] ss:$0 sm:$0xff]  ;;  %v452_v51 = vld [vmem:[%s636_s4 + $0x1] ss:$0 sm:$0xff] }
   0x5   :  { %438 = vmatmul.msk.f32.vlgmr.msra.gmra.mxu0 %vm26_vm1, %v20_v2 }
   0x6   :  { %135 = vmatpush.msra.mxu1 %v109_v6 }
   0x8   :  { %136 = vmatpush.msra.mxu1 %v108_v7 }
   0xd   :  { %439 = vmatmul.msk.f32.gmra.mxu0 %vm26_vm1, %v21_v3 }
  0x82   :  { %v54_v9 = vpop.f32.mrf.mxu0 }
  0x83   :  { %v55_v10 = vadd.f32 %v451_v8, %v54_v9 }
  0x85   :  { %v60_v11 = vmin.f32 %v55_v10, 20.0  ;;  %vm102_vm8 = vcmp.gt.f32.partialorder %v55_v10, 20.0 }
  0x87   :  { %v62_v12 = vmul.f32 1.442695, %v60_v11  ;;  %v445_v11 = vld [vmem:[%s637_s2 + $0x38] sm:$0xff] }
  0x88   :  { %276 = vmatpush.msra.mxu2 %v445_v11 }
  0x89   :  { %461 = vpow2.f32 %v62_v12  ;;  %v444_v12 = vld [vmem:[%s637_s2 + $0x30] sm:$0xff] }
  0x8a   :  { %v57_v13 = vpop.f32.mrf.mxu0  ;;  %277 = vmatpush.msra.mxu2 %v444_v12 }
  0x8b   :  { %v58_v14 = vadd.f32 %v451_v8, %v57_v13 }
  0x8d   :  { %v61_v15 = vmin.f32 %v58_v14, 20.0  ;;  %vm103_vm12 = vcmp.gt.f32.partialorder %v58_v14, 20.0 }
  0x8f   :  { %v462_v16 = vpop.eup %461  ;;  %v64_v17 = vmul.f32 1.442695, %v61_v15  ;;  %v443_v15 = vld [vmem:[%s637_s2 + $0x28] sm:$0xff] }
  0x90   :  { %v66_v18 = vadd.f32 2.0, %v462_v16  ;;  %278 = vmatpush.msra.mxu2 %v443_v15 }
  0x91   :  { %463 = vpow2.f32 %v64_v17  ;;  %v442_v17 = vld [vmem:[%s637_s2 + $0x20] sm:$0xff] }
  0x92   :  { %v68_v19 = vmul.f32 %v462_v16, %v66_v18  ;;  %279 = vmatpush.msra.mxu2 %v442_v17 }
  0x94   :  { %v70_v20 = vadd.f32 2.0, %v68_v19 }
  0x96   :  { %465 = vrcp.f32 %v70_v20  ;;  %v83_v28 = vand.u32 2147483648, %v70_v20  ;;  %v81_v30 = vand.u32 2147483647, %v70_v20  ;;  %vm77_vm3 = vweird.f32 %v70_v20 }
  0x97   :  { %v464_v21 = vpop.eup %463 }
  0x98   :  { %v67_v22 = vadd.f32 2.0, %v464_v21  ;;  %v84_v33 = vor.u32 1.1754944e-38, %v83_v28  ;;  %vm82_vm5 = vcmp.eq.f32.partialorder %v81_v30, 8.507059e+37 }
  0x9a   :  { %v69_v23 = vmul.f32 %v464_v21, %v67_v22 }
  0x9c   :  { %v466_v24 = vpop.eup %465  ;;  %v71_v25 = vadd.f32 2.0, %v69_v23 }
  0x9d   :  { %v73_v26 = vmul.f32 %v466_v24, %v70_v20  ;;  %vm78_vm2 = vweird.f32 %v466_v24 }
  0x9e   :  { %467 = vrcp.f32 %v71_v25  ;;  %vm79_vm4 = vmor %vm77_vm3, %vm78_vm2  ;;  %v98_v39 = vand.u32 2147483648, %v71_v25  ;;  %v96_v42 = vand.u32 2147483647, %v71_v25  ;;  %vm92_vm9 = vweird.f32 %v71_v25 }
  0x9f   :  { %v74_v27 = vsub.f32 1.0, %v73_v26  ;;  %469 = vrcp.f32 %v495_v58 }
  0xa0   :  { %v99_v45 = vor.u32 1.1754944e-38, %v98_v39  ;;  %vm97_vm11 = vcmp.eq.f32.partialorder %v96_v42, 8.507059e+37 }
  0xa1   :  { %v75_v29 = vmul.f32 %v466_v24, %v74_v27 }
  0xa3   :  { %v76_v31 = vadd.f32 %v466_v24, %v75_v29  ;;  %v453_v29 = vld [vmem:[%s636_s4 + $0x3] ss:$0 sm:$0xff] }
  0xa4   :  { %v468_v32 = vpop.eup %467 }
  0xa5   :  { %v80_v34 = vsel %vm79_vm4, %v466_v24, %v76_v31  ;;  %v88_v35 = vmul.f32 %v468_v32, %v71_v25  ;;  %vm93_vm7 = vweird.f32 %v468_v32  ;;  %v470_v59 = vpop.eup %469 }
  0xa6   :  { %v85_v36 = vsel %vm82_vm5, %v84_v33, %v80_v34  ;;  %vm94_vm10 = vmor %vm92_vm9, %vm93_vm7  ;;  %v153_v60 = vmul.f32 32.0, %v470_v59  ;;  %vm157_vm13 = vweird.f32 %v470_v59  ;;  %v454_v33 = vld [vmem:[%s636_s4 + $0x5] ss:$0 sm:$0xff] }
  0xa7   :  { %v86_v37 = vmul.f32 %v85_v36, %v68_v19  ;;  %v89_v38 = vsub.f32 1.0, %v88_v35 }
  0xa8   :  { %v154_v61 = vsub.f32 1.0, %v153_v60 }
  0xa9   :  { %v104_v40 = vmul.f32 %v86_v37, %v55_v10  ;;  %v90_v41 = vmul.f32 %v468_v32, %v89_v38 }
  0xaa   :  { %v155_v62 = vmul.f32 %v470_v59, %v154_v61 }
  0xab   :  { %v106_v43 = vsel %vm102_vm8, %v55_v10, %v104_v40  ;;  %v91_v44 = vadd.f32 %v468_v32, %v90_v41 }
  0xac   :  { %440 = vmatmul.msk.f32.vlgmr.msra.gmra.mxu1 %vm114_vm6, %v106_v43  ;;  %v156_v63 = vadd.f32 %v470_v59, %v155_v62 }
  0xad   :  { %v95_v46 = vsel %vm94_vm10, %v468_v32, %v91_v44 }
  0xae   :  { %v100_v47 = vsel %vm97_vm11, %v99_v45, %v95_v46  ;;  %v560_v0 = vsel %vm157_vm13, %v470_v59, %v156_v63 }
  0xaf   :  { %v101_v48 = vmul.f32 %v100_v47, %v69_v23 }
  0xb1   :  { %v105_v49 = vmul.f32 %v101_v48, %v58_v14 }
  0xb3   :  { %v107_v50 = vsel %vm103_vm12, %v58_v14, %v105_v49 }
  0xb4   :  { %441 = vmatmul.msk.f32.gmra.mxu1 %vm114_vm6, %v107_v50 }
 0x129   :  { %v138_v52 = vpop.f32.mrf.mxu1 }
 0x12a   :  { %v139_v53 = vadd.f32 %v452_v51, %v138_v52 }
 0x12c   :  { %v146_v54 = vsel %vm114_vm6, %v139_v53, 0.0 }
 0x12d   :  { %147 = vadd.xlane.f32.xlu0 %v146_v54 }
 0x131   :  { %v141_v55 = vpop.f32.mrf.mxu1 }
 0x132   :  { %v142_v56 = vadd.f32 %v452_v51, %v141_v55 }
 0x134   :  { %v149_v57 = vsel %vm114_vm6, %v142_v56, 0.0 }
 0x135   :  { %150 = vadd.xlane.f32.xlu0 %v149_v57 }
 0x1a0   :  { %v148_v1 = vpop.xlane.xlu0 %147 }
 0x1a1   :  { %v159_v2 = vmul.f32 %v560_v0, %v148_v1 }
 0x1a3   :  { %v161_v3 = vsub.f32 %v139_v53, %v159_v2 }
 0x1a5   :  { %v163_v4 = vmul.f32 %v161_v3, %v161_v3 }
 0x1a7   :  { %v165_v5 = vsel %vm114_vm6, %v163_v4, 0.0 }
 0x1a8   :  { %166 = vadd.xlane.f32.xlu1 %v165_v5  ;;  %v151_v6 = vpop.xlane.xlu0 %150 }
 0x1a9   :  { %v160_v7 = vmul.f32 %v560_v0, %v151_v6 }
 0x1ab   :  { %v162_v8 = vsub.f32 %v142_v56, %v160_v7 }
 0x1ad   :  { %v164_v9 = vmul.f32 %v162_v8, %v162_v8 }
 0x1af   :  { %v168_v10 = vsel %vm114_vm6, %v164_v9, 0.0 }
 0x1b0   :  { %169 = vadd.xlane.f32.xlu1 %v168_v10 }
 0x21b   :  { %v167_v13 = vpop.xlane.xlu1 %166 }
 0x21c   :  { %v171_v14 = vmul.f32 %v167_v13, %v560_v0 }
 0x21e   :  { %v173_v16 = vadd.f32 1e-05, %v171_v14 }
 0x220   :  { %471 = vrsqrt.f32 %v173_v16  ;;  %vm181_vm15 = vweird.f32 %v173_v16 }
 0x223   :  { %v170_v18 = vpop.xlane.xlu1 %169 }
 0x224   :  { %v172_v19 = vmul.f32 %v170_v18, %v560_v0  ;;  %v455_v18 = vld [vmem:[%s636_s4 + $0x2] ss:$0 sm:$0xff] }
 0x226   :  { %v472_v20 = vpop.eup %471  ;;  %v174_v21 = vadd.f32 1e-05, %v172_v19 }
 0x227   :  { %v176_v22 = vmul.f32 %v472_v20, %v173_v16  ;;  %vm182_vm14 = vweird.f32 %v472_v20 }
 0x228   :  { %473 = vrsqrt.f32 %v174_v21  ;;  %vm183_vm0 = vmor %vm181_vm15, %vm182_vm14  ;;  %vm191_vm2 = vweird.f32 %v174_v21 }
 0x229   :  { %v177_v23 = vmul.f32 %v472_v20, %v176_v22 }
 0x22b   :  { %v178_v24 = vmul.f32 0.5, %v177_v23 }
 0x22d   :  { %v179_v25 = vsub.f32 1.5, %v178_v24 }
 0x22e   :  { %v474_v26 = vpop.eup %473 }
 0x22f   :  { %v180_v27 = vmul.f32 %v472_v20, %v179_v25  ;;  %v186_v28 = vmul.f32 %v474_v26, %v174_v21  ;;  %vm192_vm1 = vweird.f32 %v474_v26 }
 0x230   :  { %vm193_vm3 = vmor %vm191_vm2, %vm192_vm1 }
 0x231   :  { %v184_v30 = vsel %vm183_vm0, %v472_v20, %v180_v27  ;;  %v187_v31 = vmul.f32 %v474_v26, %v186_v28 }
 0x232   :  { %v195_v32 = vmul.f32 %v184_v30, %v161_v3 }
 0x233   :  { %v188_v34 = vmul.f32 0.5, %v187_v31 }
 0x234   :  { %v198_v35 = vmul.f32 %v453_v29, %v195_v32 }
 0x235   :  { %v189_v36 = vsub.f32 1.5, %v188_v34 }
 0x236   :  { %v201_v37 = vadd.f32 %v454_v33, %v198_v35  ;;  %v390_v35 = vld [vmem:[%s638_s3 + $0x18] sm:$0xff] }
 0x237   :  { %v190_v38 = vmul.f32 %v474_v26, %v189_v36  ;;  %v389_v36 = vld [vmem:[%s638_s3 + $0x10] sm:$0xff]  ;;  %411 = vmatpush.msra.mxu3 %v390_v35 }
 0x238   :  { %v203_v39 = vmin.f32 %v201_v37, 20.0  ;;  %vm245_vm10 = vcmp.gt.f32.partialorder %v201_v37, 20.0 }
 0x239   :  { %v194_v40 = vsel %vm193_vm3, %v474_v26, %v190_v38  ;;  %412 = vmatpush.msra.mxu3 %v389_v36 }
 0x23a   :  { %v196_v41 = vmul.f32 %v194_v40, %v162_v8  ;;  %v205_v42 = vmul.f32 1.442695, %v203_v39  ;;  %v388_v39 = vld [vmem:[%s638_s3 + $0x8] sm:$0xff] }
 0x23b   :  { %413 = vmatpush.msra.mxu3 %v388_v39 }
 0x23c   :  { %475 = vpow2.f32 %v205_v42  ;;  %v199_v43 = vmul.f32 %v453_v29, %v196_v41  ;;  %v387_v41 = vld [vmem:[%s638_s3] sm:$0xff] }
 0x23d   :  { %414 = vmatpush.msra.mxu3 %v387_v41  ;;  %v458_v41 = vld [vmem:[%s636_s4 + $0x7] ss:$0 sm:$0xff] }
 0x23e   :  { %v202_v44 = vadd.f32 %v454_v33, %v199_v43 }
 0x240   :  { %v204_v45 = vmin.f32 %v202_v44, 20.0  ;;  %vm246_vm14 = vcmp.gt.f32.partialorder %v202_v44, 20.0 }
 0x242   :  { %v476_v46 = vpop.eup %475  ;;  %v207_v47 = vmul.f32 1.442695, %v204_v45 }
 0x243   :  { %v209_v48 = vadd.f32 2.0, %v476_v46 }
 0x244   :  { %477 = vpow2.f32 %v207_v47 }
 0x245   :  { %v211_v49 = vmul.f32 %v476_v46, %v209_v48 }
 0x247   :  { %v213_v50 = vadd.f32 2.0, %v211_v49 }
 0x249   :  { %479 = vrcp.f32 %v213_v50  ;;  %v226_v58 = vand.u32 2147483648, %v213_v50  ;;  %v224_v60 = vand.u32 2147483647, %v213_v50  ;;  %vm220_vm5 = vweird.f32 %v213_v50 }
 0x24a   :  { %v478_v51 = vpop.eup %477 }
 0x24b   :  { %v210_v52 = vadd.f32 2.0, %v478_v51  ;;  %v227_v63 = vor.u32 1.1754944e-38, %v226_v58  ;;  %vm225_vm8 = vcmp.eq.f32.partialorder %v224_v60, 8.507059e+37 }
 0x24d   :  { %v212_v53 = vmul.f32 %v478_v51, %v210_v52 }
 0x24f   :  { %v480_v54 = vpop.eup %479  ;;  %v214_v55 = vadd.f32 2.0, %v212_v53 }
 0x250   :  { %v216_v56 = vmul.f32 %v480_v54, %v213_v50  ;;  %vm221_vm4 = vweird.f32 %v480_v54 }
 0x251   :  { %481 = vrcp.f32 %v214_v55  ;;  %vm222_vm7 = vmor %vm220_vm5, %vm221_vm4  ;;  %v241_v6 = vand.u32 2147483648, %v214_v55  ;;  %v239_v9 = vand.u32 2147483647, %v214_v55  ;;  %vm235_vm11 = vweird.f32 %v214_v55 }
 0x252   :  { %v217_v57 = vsub.f32 1.0, %v216_v56  ;;  %v457_v56 = vld [vmem:[%s636_s4 + $0x6] ss:$0 sm:$0xff] }
 0x253   :  { %v242_v12 = vor.u32 1.1754944e-38, %v241_v6  ;;  %vm240_vm13 = vcmp.eq.f32.partialorder %v239_v9, 8.507059e+37 }
 0x254   :  { %v218_v59 = vmul.f32 %v480_v54, %v217_v57 }
 0x256   :  { %v219_v61 = vadd.f32 %v480_v54, %v218_v59 }
 0x257   :  { %v482_v62 = vpop.eup %481 }
 0x258   :  { %v223_v1 = vsel %vm222_vm7, %v480_v54, %v219_v61  ;;  %v231_v2 = vmul.f32 %v482_v62, %v214_v55  ;;  %vm236_vm9 = vweird.f32 %v482_v62 }
 0x259   :  { %v228_v3 = vsel %vm225_vm8, %v227_v63, %v223_v1  ;;  %vm237_vm12 = vmor %vm235_vm11, %vm236_vm9 }
 0x25a   :  { %v229_v4 = vmul.f32 %v228_v3, %v211_v49  ;;  %v232_v5 = vsub.f32 1.0, %v231_v2 }
 0x25c   :  { %v247_v7 = vmul.f32 %v229_v4, %v201_v37  ;;  %v233_v8 = vmul.f32 %v482_v62, %v232_v5 }
 0x25e   :  { %v249_v10 = vsel %vm245_vm10, %v201_v37, %v247_v7  ;;  %v234_v11 = vadd.f32 %v482_v62, %v233_v8 }
 0x25f   :  { %446 = vmatmul.msk.f32.vlgmr.msra.gmra.mxu2 %vm114_vm6, %v249_v10 }
 0x260   :  { %v238_v13 = vsel %vm237_vm12, %v482_v62, %v234_v11 }
 0x261   :  { %v243_v14 = vsel %vm240_vm13, %v242_v12, %v238_v13 }
 0x262   :  { %v244_v15 = vmul.f32 %v243_v14, %v212_v53  ;;  %v456_v53 = vld [vmem:[%s636_s4 + $0x4] ss:$0 sm:$0xff] }
 0x264   :  { %v248_v16 = vmul.f32 %v244_v15, %v202_v44 }
 0x266   :  { %v250_v17 = vsel %vm246_vm14, %v202_v44, %v248_v16 }
 0x267   :  { %447 = vmatmul.msk.f32.gmra.mxu2 %vm114_vm6, %v250_v17 }
 0x2e2   :  { %v281_v19 = vpop.f32.mrf.mxu2 }
 0x2e3   :  { %v282_v20 = vadd.f32 %v455_v18, %v281_v19 }
 0x2e5   :  { %v289_v21 = vsel %vm114_vm6, %v282_v20, 0.0 }
 0x2e6   :  { %290 = vadd.xlane.f32.xlu2 %v289_v21 }
 0x2ea   :  { %v284_v22 = vpop.f32.mrf.mxu2 }
 0x2eb   :  { %v285_v23 = vadd.f32 %v455_v18, %v284_v22 }
 0x2ed   :  { %v292_v24 = vsel %vm114_vm6, %v285_v23, 0.0 }
 0x2ee   :  { %293 = vadd.xlane.f32.xlu2 %v292_v24 }
 0x359   :  { %v291_v25 = vpop.xlane.xlu2 %290 }
 0x35a   :  { %v295_v26 = vmul.f32 %v291_v25, %v560_v0 }
 0x35c   :  { %v297_v27 = vsub.f32 %v282_v20, %v295_v26 }
 0x35e   :  { %v299_v28 = vmul.f32 %v297_v27, %v297_v27 }
 0x360   :  { %v301_v29 = vsel %vm114_vm6, %v299_v28, 0.0 }
 0x361   :  { %302 = vadd.xlane.f32.xlu0 %v301_v29  ;;  %v294_v30 = vpop.xlane.xlu2 %293 }
 0x362   :  { %v296_v31 = vmul.f32 %v294_v30, %v560_v0 }
 0x364   :  { %v298_v32 = vsub.f32 %v285_v23, %v296_v31 }
 0x366   :  { %v300_v33 = vmul.f32 %v298_v32, %v298_v32 }
 0x368   :  { %v304_v34 = vsel %vm114_vm6, %v300_v33, 0.0 }
 0x369   :  { %305 = vadd.xlane.f32.xlu1 %v304_v34 }
 0x3d4   :  { %v303_v37 = vpop.xlane.xlu0 %302 }
 0x3d5   :  { %v307_v38 = vmul.f32 %v303_v37, %v560_v0 }
 0x3d7   :  { %v309_v40 = vadd.f32 1e-05, %v307_v38 }
 0x3d9   :  { %483 = vrsqrt.f32 %v309_v40  ;;  %vm317_vm0 = vweird.f32 %v309_v40 }
 0x3dc   :  { %v306_v42 = vpop.xlane.xlu1 %305 }
 0x3dd   :  { %v308_v43 = vmul.f32 %v306_v42, %v560_v0  ;;  %v459_v42 = vld [vmem:[%s636_s4 + $0x8] ss:$0 sm:$0xff] }
 0x3df   :  { %v484_v44 = vpop.eup %483  ;;  %v310_v45 = vadd.f32 1e-05, %v308_v43 }
 0x3e0   :  { %v312_v46 = vmul.f32 %v484_v44, %v309_v40  ;;  %vm318_vm15 = vweird.f32 %v484_v44 }
 0x3e1   :  { %485 = vrsqrt.f32 %v310_v45  ;;  %vm319_vm1 = vmor %vm317_vm0, %vm318_vm15  ;;  %vm327_vm3 = vweird.f32 %v310_v45  ;;  %vm430_vm0 = vcmask 31744  }
 0x3e2   :  { %v313_v47 = vmul.f32 %v484_v44, %v312_v46 }
 0x3e4   :  { %v314_v48 = vmul.f32 0.5, %v313_v47 }
 0x3e6   :  { %v315_v49 = vsub.f32 1.5, %v314_v48 }
 0x3e7   :  { %v486_v50 = vpop.eup %485 }
 0x3e8   :  { %v316_v51 = vmul.f32 %v484_v44, %v315_v49  ;;  %v322_v52 = vmul.f32 %v486_v50, %v310_v45  ;;  %vm328_vm2 = vweird.f32 %v486_v50  ;;  %v460_v45 = vld [vmem:[%s636_s4 + $0x9] ss:$0 sm:$0xff] }
 0x3e9   :  { %vm329_vm4 = vmor %vm327_vm3, %vm328_vm2 }
 0x3ea   :  { %v320_v54 = vsel %vm319_vm1, %v484_v44, %v316_v51  ;;  %v323_v55 = vmul.f32 %v486_v50, %v322_v52 }
 0x3eb   :  { %v331_v0 = vmul.f32 %v320_v54, %v297_v27 }
 0x3ec   :  { %v324_v57 = vmul.f32 0.5, %v323_v55 }
 0x3ed   :  { %v334_v58 = vmul.f32 %v456_v53, %v331_v0 }
 0x3ee   :  { %v325_v59 = vsub.f32 1.5, %v324_v57 }
 0x3ef   :  { %v337_v60 = vadd.f32 %v457_v56, %v334_v58 }
 0x3f0   :  { %v326_v61 = vmul.f32 %v486_v50, %v325_v59 }
 0x3f1   :  { %v339_v62 = vmin.f32 %v337_v60, 20.0  ;;  %vm381_vm11 = vcmp.gt.f32.partialorder %v337_v60, 20.0 }
 0x3f2   :  { %v330_v63 = vsel %vm329_vm4, %v486_v50, %v326_v61 }
 0x3f3   :  { %v332_v1 = vmul.f32 %v330_v63, %v298_v32  ;;  %v341_v2 = vmul.f32 1.442695, %v339_v62 }
 0x3f5   :  { %487 = vpow2.f32 %v341_v2  ;;  %v335_v3 = vmul.f32 %v456_v53, %v332_v1 }
 0x3f7   :  { %v338_v4 = vadd.f32 %v457_v56, %v335_v3 }
 0x3f9   :  { %v340_v5 = vmin.f32 %v338_v4, 20.0  ;;  %vm382_vm15 = vcmp.gt.f32.partialorder %v338_v4, 20.0 }
 0x3fb   :  { %v488_v6 = vpop.eup %487  ;;  %v343_v7 = vmul.f32 1.442695, %v340_v5 }
 0x3fc   :  { %v345_v8 = vadd.f32 2.0, %v488_v6 }
 0x3fd   :  { %489 = vpow2.f32 %v343_v7 }
 0x3fe   :  { %v347_v9 = vmul.f32 %v488_v6, %v345_v8 }
 0x400   :  { %v349_v10 = vadd.f32 2.0, %v347_v9 }
 0x402   :  { %491 = vrcp.f32 %v349_v10  ;;  %v362_v18 = vand.u32 2147483648, %v349_v10  ;;  %v360_v20 = vand.u32 2147483647, %v349_v10  ;;  %vm356_vm7 = vweird.f32 %v349_v10 }
 0x403   :  { %v490_v11 = vpop.eup %489 }
 0x404   :  { %v346_v12 = vadd.f32 2.0, %v490_v11  ;;  %v363_v23 = vor.u32 1.1754944e-38, %v362_v18  ;;  %vm361_vm9 = vcmp.eq.f32.partialorder %v360_v20, 8.507059e+37 }
 0x406   :  { %v348_v13 = vmul.f32 %v490_v11, %v346_v12 }
 0x408   :  { %v492_v14 = vpop.eup %491  ;;  %v350_v15 = vadd.f32 2.0, %v348_v13 }
 0x409   :  { %v352_v16 = vmul.f32 %v492_v14, %v349_v10  ;;  %vm357_vm5 = vweird.f32 %v492_v14 }
 0x40a   :  { %493 = vrcp.f32 %v350_v15  ;;  %vm358_vm8 = vmor %vm356_vm7, %vm357_vm5  ;;  %v377_v29 = vand.u32 2147483648, %v350_v15  ;;  %v375_v32 = vand.u32 2147483647, %v350_v15  ;;  %vm371_vm12 = vweird.f32 %v350_v15 }
 0x40b   :  { %v353_v17 = vsub.f32 1.0, %v352_v16 }
 0x40c   :  { %v378_v35 = vor.u32 1.1754944e-38, %v377_v29  ;;  %vm376_vm14 = vcmp.eq.f32.partialorder %v375_v32, 8.507059e+37 }
 0x40d   :  { %v354_v19 = vmul.f32 %v492_v14, %v353_v17 }
 0x40f   :  { %v355_v21 = vadd.f32 %v492_v14, %v354_v19 }
 0x410   :  { %v494_v22 = vpop.eup %493 }
 0x411   :  { %v359_v24 = vsel %vm358_vm8, %v492_v14, %v355_v21  ;;  %v367_v25 = vmul.f32 %v494_v22, %v350_v15  ;;  %vm372_vm10 = vweird.f32 %v494_v22 }
 0x412   :  { %v364_v26 = vsel %vm361_vm9, %v363_v23, %v359_v24  ;;  %vm373_vm13 = vmor %vm371_vm12, %vm372_vm10 }
 0x413   :  { %v365_v27 = vmul.f32 %v364_v26, %v347_v9  ;;  %v368_v28 = vsub.f32 1.0, %v367_v25 }
 0x415   :  { %v383_v30 = vmul.f32 %v365_v27, %v337_v60  ;;  %v369_v31 = vmul.f32 %v494_v22, %v368_v28 }
 0x417   :  { %v385_v33 = vsel %vm381_vm11, %v337_v60, %v383_v30  ;;  %v370_v34 = vadd.f32 %v494_v22, %v369_v31 }
 0x418   :  { %448 = vmatmul.msk.f32.vlgmr.msra.gmra.mxu3 %vm114_vm6, %v385_v33 }
 0x419   :  { %v374_v36 = vsel %vm373_vm13, %v494_v22, %v370_v34 }
 0x41a   :  { %v379_v37 = vsel %vm376_vm14, %v378_v35, %v374_v36 }
 0x41b   :  { %v380_v38 = vmul.f32 %v379_v37, %v348_v13 }
 0x41d   :  { %v384_v39 = vmul.f32 %v380_v38, %v338_v4 }
 0x41f   :  { %v386_v40 = vsel %vm382_vm15, %v338_v4, %v384_v39 }
 0x420   :  { %449 = vmatmul.msk.f32.gmra.mxu3 %vm114_vm6, %v386_v40 }
 0x49b   :  { %v416_v43 = vpop.f32.mrf.mxu3 }
 0x49c   :  { %v417_v44 = vadd.f32 %v458_v41, %v416_v43 }
 0x49e   :  { %v424_v46 = vmax.f32 %v417_v44, %v459_v42 }
 0x4a0   :  { %v428_v47 = vmin.f32 %v424_v46, %v460_v45 }
 0x4a2   :  { %431 = vst.msk [vmem:[%s639_s5] sm:$0xff] %vm430_vm0, %v428_v47 }
 0x4a3   :  { %v419_v48 = vpop.f32.mrf.mxu3 }
 0x4a4   :  { %v420_v49 = vadd.f32 %v458_v41, %v419_v48 }
 0x4a6   :  { %v425_v50 = vmax.f32 %v420_v49, %v459_v42 }
 0x4a8   :  { %v429_v51 = vmin.f32 %v425_v50, %v460_v45 }
 0x4aa   :  { %432 = vst.msk [vmem:[%s639_s5 + $0x8] sm:$0xff] %vm430_vm0, %v429_v51 }

</bundles_post_ra>
